<compile_context>
chip_gen: v7x
topology: tpu7x:2x2x1
jax: 0.10.0
libtpu: 0.0.40
codegen_flags: <defaults>
</compile_context>

<pallas_src>
import functools

import jax
import jax.numpy as jnp
from jax import lax
from jax.experimental import pallas as pl
from jax.experimental.pallas import tpu as pltpu

# x @ W.T without ever materializing W.T (contract last dims of both operands)
_CONTRACT_LAST = (((1,), (1,)), ((), ()))


# ------------------------------ tiling helpers -------------------------------

def _pick_tile(dim, cap, align):
    """Largest legal tile: the full dim if it fits under `cap`, else the largest
    multiple of `align` <= cap that divides `dim`; falls back to the full dim
    (always a legal block shape) when no aligned divisor exists."""
    if dim <= cap:
        return dim
    t = (cap // align) * align
    while t >= align:
        if dim % t == 0:
            return t
        t -= align
    # TODO(synk): pad + mask ragged tails instead of falling back to the full dim.
    return dim


def _split_for_parallel(dim, t, align):
    """Smaller aligned divisor of `dim` (so the parallel grid gets >=2 points for
    v7x's two TensorCores); returns `t` unchanged if no such divisor exists."""
    cand = ((t // 2) // align) * align
    while cand >= align:
        if dim % cand == 0:
            return cand
        cand -= align
    return t


# --------------------------- in-kernel shared math ---------------------------

def _project(x, w_ref):
    """y = x @ W.T with W in the native nn.Linear (out_features, in_features) layout."""
    return lax.dot_general(x, w_ref[...], _CONTRACT_LAST,
                           preferred_element_type=jnp.float32)


def _attention_and_unify(qp, kp, vp, wu_ref, bu_ref, heads, d):
    """Per-head softmax(q k^T) v (NO 1/sqrt(d) scaling — the module does not scale),
    then the fused unifyheads projection (x @ Wu.T + bu) on the concatenated heads.

    Softmax normalization is applied AFTER the PV matmul ((tq, d) multiply instead of
    (tq, Sk)); the reciprocal uses the otherwise-idle EUP slot (approx vrcp).
    """
    # TODO(synk): for very long Sk add flash-style online-softmax KV tiling (extra
    # "arbitrary" grid axis + m/l/acc scratch); the wrappers only route shapes here
    # whose full K/V fit comfortably in VMEM.
    outs = []
    for h in range(heads):                      # heads is small & static
        sl = slice(h * d, (h + 1) * d)
        s = lax.dot_general(qp[:, sl], kp[:, sl], _CONTRACT_LAST,
                            preferred_element_type=jnp.float32)          # (tq, Sk)
        m = jnp.max(s, axis=-1, keepdims=True)
        p = jnp.exp(s - m)
        denom = jnp.sum(p, axis=-1, keepdims=True)
        o_h = jnp.dot(p, vp[:, sl], preferred_element_type=jnp.float32)  # (tq, d)
        outs.append(o_h * pl.reciprocal(denom, approx=True))
    o_cat = jnp.concatenate(outs, axis=-1)                               # (tq, H*d) lane-dense
    return (lax.dot_general(o_cat, wu_ref[...], _CONTRACT_LAST,
                            preferred_element_type=jnp.float32)
            + bu_ref[...])


# -------------------- fully fused single-kernel MHA (small) -------------------

def _fused_self_mha_kernel(x_ref, wq_ref, wk_ref, wv_ref, wu_ref, bu_ref, o_ref,
                           *, heads, d):
    x = x_ref[0]                        # (S, d_model) — read ONCE for q/k/v
    qp = _project(x, wq_ref)            # (S, H*d)
    kp = _project(x, wk_ref)
    vp = _project(x, wv_ref)
    o_ref[0] = _attention_and_unify(qp, kp, vp, wu_ref, bu_ref, heads, d)


def _fused_cross_mha_kernel(q_ref, k_ref, v_ref, wq_ref, wk_ref, wv_ref, wu_ref,
                            bu_ref, o_ref, *, heads, d):
    qp = _project(q_ref[0], wq_ref)
    kp = _project(k_ref[0], wk_ref)
    vp = _project(v_ref[0], wv_ref)
    o_ref[0] = _attention_and_unify(qp, kp, vp, wu_ref, bu_ref, heads, d)


def _fused_forward(q, k, v, params, heads, d_model, self_attention):
    b, sq, _ = q.shape
    _, sk, _ = k.shape
    hd = heads * d_model
    bu2 = params["bu"].reshape(1, d_model).astype(jnp.float32)
    weights = (params["wq"].astype(jnp.float32),
               params["wk"].astype(jnp.float32),
               params["wv"].astype(jnp.float32),
               params["wu"].astype(jnp.float32),
               bu2)

    w_specs = [pl.BlockSpec((hd, d_model), lambda gb: (0, 0)),   # wq
               pl.BlockSpec((hd, d_model), lambda gb: (0, 0)),   # wk
               pl.BlockSpec((hd, d_model), lambda gb: (0, 0)),   # wv
               pl.BlockSpec((d_model, hd), lambda gb: (0, 0)),   # wu
               pl.BlockSpec((1, d_model), lambda gb: (0, 0))]    # bu
    q_spec = pl.BlockSpec((1, sq, d_model), lambda gb: (gb, 0, 0))
    kv_spec = pl.BlockSpec((1, sk, d_model), lambda gb: (gb, 0, 0))
    common = dict(
        out_shape=jax.ShapeDtypeStruct((b, sq, d_model), jnp.float32),
        grid=(b,),
        out_specs=pl.BlockSpec((1, sq, d_model), lambda gb: (gb, 0, 0)),
        compiler_params=pltpu.CompilerParams(dimension_semantics=("parallel",)),
    )

    if self_attention:
        kern = functools.partial(_fused_self_mha_kernel, heads=heads, d=d_model)
        return pl.pallas_call(kern, in_specs=[q_spec] + w_specs, **common)(q, *weights)
    kern = functools.partial(_fused_cross_mha_kernel, heads=heads, d=d_model)
    return pl.pallas_call(kern, in_specs=[q_spec, kv_spec, kv_spec] + w_specs,
                          **common)(q, k, v, *weights)


# ------------------- tiled projection matmul (general path) -------------------

def _proj_kernel(x_ref, w_ref, o_ref, acc_ref):
    # grid = (M/tm, N/tn, K/tk); reduction axis last; f32 accumulator in VMEM.
    @pl.when(pl.program_id(2) == 0)
    def _init():
        acc_ref[...] = jnp.zeros_like(acc_ref)

    acc_ref[...] += lax.dot_general(x_ref[...], w_ref[...], _CONTRACT_LAST,
                                    preferred_element_type=jnp.float32)

    @pl.when(pl.program_id(2) == pl.num_programs(2) - 1)
    def _flush():
        o_ref[...] = acc_ref[...].astype(o_ref.dtype)


def pallas_linear(x, w, *, tm_cap=512, tn_cap=512, tk_cap=512):
    """y = x @ W.T ; x: (M, K), w: (N, K) — native nn.Linear layout, no wrapper .T."""
    M, K = x.shape
    N, K2 = w.shape
    assert K == K2
    tm = _pick_tile(M, tm_cap, 8)
    tn = _pick_tile(N, tn_cap, 128)
    tk = _pick_tile(K, tk_cap, 128)
    # v7x megacore: ensure >=2 parallel grid points when the grid would collapse.
    # (On single-TC v5e/v6e this only costs a couple of ~0.35us grid steps.)
    if (M // tm) * (N // tn) < 2:
        tn2 = _split_for_parallel(N, tn, 128)
        if tn2 < tn:
            tn = tn2
        else:
            tm = _split_for_parallel(M, tm, 8)
    grid = (M // tm, N // tn, K // tk)
    # NOTE: on v5e/v6e (128 MiB VMEM) tm/tn caps of 1024 + vmem_limit_bytes~32MiB
    # amortize per-step overhead further; 512 fits the default scoped VMEM budget
    # on all of v5e/v6e/v7x, so no limit override is needed here.
    return pl.pallas_call(
        _proj_kernel,
        out_shape=jax.ShapeDtypeStruct((M, N), jnp.float32),
        grid=grid,
        in_specs=[pl.BlockSpec((tm, tk), lambda i, j, kk: (i, kk)),
                  pl.BlockSpec((tn, tk), lambda i, j, kk: (j, kk))],
        out_specs=pl.BlockSpec((tm, tn), lambda i, j, kk: (i, j)),
        scratch_shapes=[pltpu.VMEM((tm, tn), jnp.float32)],
        compiler_params=pltpu.CompilerParams(
            dimension_semantics=("parallel", "parallel", "arbitrary")),
    )(x, w)


# ----------------- attention + fused unifyheads (general path) ----------------

def _attn_unify_kernel(q_ref, k_ref, v_ref, wu_ref, bu_ref, o_ref, *, heads, d):
    o_ref[0] = _attention_and_unify(q_ref[0], k_ref[0], v_ref[0],
                                    wu_ref, bu_ref, heads, d)


def pallas_attention_unify(qp, kp, vp, wu, bu2, *, heads, d,
                           q_blk=0, k_blk=0, v_blk=0, tq_cap=256):
    """softmax(q k^T) v per head + fused unifyheads epilogue (y = o @ Wu.T + bu).

    qp/kp/vp may all be the SAME (b, s, 3*h*d) array (fused QKV projection): the
    last-dim BLOCK index q_blk/k_blk/v_blk selects the 128-lane-aligned head group,
    so no XLA slice of the projected activations is ever materialized.
    """
    b, sq, _ = qp.shape
    _, sk, _ = kp.shape
    hd = heads * d
    d_model = wu.shape[0]
    tq = _pick_tile(sq, tq_cap, 8)
    kern = functools.partial(_attn_unify_kernel, heads=heads, d=d)
    return pl.pallas_call(
        kern,
        out_shape=jax.ShapeDtypeStruct((b, sq, d_model), jnp.float32),
        grid=(b, sq // tq),
        in_specs=[
            pl.BlockSpec((1, tq, hd), lambda gb, gi, blk=q_blk: (gb, gi, blk)),
            pl.BlockSpec((1, sk, hd), lambda gb, gi, blk=k_blk: (gb, 0, blk)),
            pl.BlockSpec((1, sk, hd), lambda gb, gi, blk=v_blk: (gb, 0, blk)),
            pl.BlockSpec((d_model, hd), lambda gb, gi: (0, 0)),
            pl.BlockSpec((1, d_model), lambda gb, gi: (0, 0)),
        ],
        out_specs=pl.BlockSpec((1, tq, d_model), lambda gb, gi: (gb, gi, 0)),
        compiler_params=pltpu.CompilerParams(
            dimension_semantics=("parallel", "parallel")),
    )(qp, kp, vp, wu, bu2)


def _general_forward(q, k, v, params, heads, d_model, self_attention):
    b, sq, _ = q.shape
    _, sk, _ = k.shape
    hd = heads * d_model
    wu = params["wu"].astype(jnp.float32)
    bu2 = params["bu"].reshape(1, d_model).astype(jnp.float32)

    if self_attention:
        # Fused QKV projection: the activations are read from HBM once.
        # NOTE: pass a pre-stacked params["wqkv"] to avoid even this tiny per-call
        # concat (no transpose is ever taken — native (N, K) layout throughout).
        wqkv = params.get("wqkv")
        if wqkv is None:
            wqkv = jnp.concatenate([params["wq"], params["wk"], params["wv"]], axis=0)
        qkv = pallas_linear(q.reshape(b * sq, d_model), wqkv.astype(jnp.float32))
        qkv = qkv.reshape(b, sq, 3 * hd)                # metadata-only reshape
        return pallas_attention_unify(qkv, qkv, qkv, wu, bu2, heads=heads, d=d_model,
                                      q_blk=0, k_blk=1, v_blk=2)

    qp = pallas_linear(q.reshape(b * sq, d_model),
                       params["wq"].astype(jnp.float32)).reshape(b, sq, hd)
    kp = pallas_linear(k.reshape(b * sk, d_model),
                       params["wk"].astype(jnp.float32)).reshape(b, sk, hd)
    vp = pallas_linear(v.reshape(b * sk, d_model),
                       params["wv"].astype(jnp.float32)).reshape(b, sk, hd)
    return pallas_attention_unify(qp, kp, vp, wu, bu2, heads=heads, d=d_model)


# -------------------------------- module forward ------------------------------

def _fused_fits(sq, sk, d_model, heads, budget_bytes=6 << 20):
    """Rough f32 VMEM residency of the fully fused kernel (per grid step)."""
    hd = heads * d_model
    resident = (
        (sq + 2 * sk) * d_model        # activation input blocks
        + (sq + 2 * sk) * hd           # qp / kp / vp
        + sq * sk                      # one head's score tile
        + sq * hd                      # concatenated head output
        + 4 * hd * d_model + d_model   # weights + bias
        + sq * d_model                 # output block
    ) * 4
    return resident * 2 < budget_bytes  # x2: double buffering + headroom


def multi_head_attention_forward(q, k, v, params, heads, d_model, *, force_general=False):
    """Pallas-backed MultiHeadAttention.forward (mask=None; dropout never applied).

    q : (batch, seq_q, d_model), k/v : (batch, seq_k, d_model)
    params: wq/wk/wv (h*d_model, d_model), wu (d_model, h*d_model), bu (d_model,)
    """
    # NOTE: identity-based fast path — equal-but-distinct q/k/v arrays take the
    # (numerically identical) cross-attention path; perf only.
    self_attention = (q is k) and (k is v)
    q = q.astype(jnp.float32)
    k = q if self_attention else k.astype(jnp.float32)
    v = q if self_attention else v.astype(jnp.float32)
    _, sq, _ = q.shape
    _, sk, _ = k.shape
    if not force_general and _fused_fits(sq, sk, d_model, heads):
        return _fused_forward(q, k, v, params, heads, d_model, self_attention)
    return _general_forward(q, k, v, params, heads, d_model, self_attention)


# ------------------------------ pure-JAX reference ----------------------------

def reference_forward(q, k, v, params, heads, d_model):
    b, sq, _ = q.shape
    _, sk, _ = k.shape
    qp = (q @ params["wq"].T).reshape(b, sq, heads, d_model).transpose(0, 2, 1, 3)
    kp = (k @ params["wk"].T).reshape(b, sk, heads, d_model).transpose(0, 2, 1, 3)
    vp = (v @ params["wv"].T).reshape(b, sk, heads, d_model).transpose(0, 2, 1, 3)
    s = jnp.einsum("bhqd,bhkd->bhqk", qp, kp)     # no 1/sqrt(d) scale (matches module)
    p = jax.nn.softmax(s, axis=-1)
    o = jnp.einsum("bhqk,bhkd->bhqd", p, vp)
    o = o.transpose(0, 2, 1, 3).reshape(b, sq, heads * d_model)
    return o @ params["wu"].T + params["bu"]


# ------------------------------------ main ------------------------------------

if __name__ == "__main__":
    heads, d_model = 4, 32
    batch, seq = 2, 8

    key = jax.random.PRNGKey(0)
    (kx, kq, kk, kv, kx2, kq2, kk2, kv2,
     kwq, kwk, kwv, kwu, kbu) = jax.random.split(key, 13)

    # activations (small shapes implied by the module)
    x = jax.random.normal(kx, (batch, seq, d_model), jnp.float32)
    q = jax.random.normal(kq, (batch, seq, d_model), jnp.float32)
    k = jax.random.normal(kk, (batch, seq, d_model), jnp.float32)
    v = jax.random.normal(kv, (batch, seq, d_model), jnp.float32)

    seq2 = 16   # exercises the tiled multi-kernel path as well
    x2 = jax.random.normal(kx2, (batch, seq2, d_model), jnp.float32)
    q2 = jax.random.normal(kq2, (batch, seq2, d_model), jnp.float32)
    k2 = jax.random.normal(kk2, (batch, seq2, d_model), jnp.float32)
    v2 = jax.random.normal(kv2, (batch, seq2, d_model), jnp.float32)

    # parameters (nn.Linear shapes: (out_features, in_features))
    scale = 0.05
    params = {
        "wq": scale * jax.random.normal(kwq, (heads * d_model, d_model), jnp.float32),
        "wk": scale * jax.random.normal(kwk, (heads * d_model, d_model), jnp.float32),
        "wv": scale * jax.random.normal(kwv, (heads * d_model, d_model), jnp.float32),
        "wu": scale * jax.random.normal(kwu, (d_model, heads * d_model), jnp.float32),
        "bu": scale * jax.random.normal(kbu, (d_model,), jnp.float32),
    }

    def check(out, ref, name):
        assert out.shape == ref.shape, name + " shape"
        assert jnp.allclose(out, ref, atol=2e-3, rtol=2e-3), name + " mismatch"

    # 1) fully fused single-kernel path, self-attention
    out = jax.block_until_ready(
        multi_head_attention_forward(x, x, x, params, heads, d_model))
    check(out, reference_forward(x, x, x, params, heads, d_model), "fused self-attention")

    # 2) fully fused single-kernel path, cross-attention
    out = jax.block_until_ready(
        multi_head_attention_forward(q, k, v, params, heads, d_model))
    check(out, reference_forward(q, k, v, params, heads, d_model), "fused cross-attention")

    # 3) tiled multi-kernel path (fused-QKV projection + attention/unify), self-attn
    out = jax.block_until_ready(
        multi_head_attention_forward(x2, x2, x2, params, heads, d_model,
                                     force_general=True))
    check(out, reference_forward(x2, x2, x2, params, heads, d_model), "tiled self-attention")

    # 4) tiled multi-kernel path (separate projections), cross-attention
    out = jax.block_until_ready(
        multi_head_attention_forward(q2, k2, v2, params, heads, d_model,
                                     force_general=True))
    check(out, reference_forward(q2, k2, v2, params, heads, d_model), "tiled cross-attention")

    print("KERNEL_OK")
</pallas_src>

<mosaic_0001>
module attributes {stable_mosaic.version = 11 : i64} {
  func.func @_fused_self_mha_kernel(%arg0: i32, %arg1: memref<1x8x32xf32, #tpu.memory_space<vmem>>, %arg2: memref<128x32xf32, #tpu.memory_space<vmem>>, %arg3: memref<128x32xf32, #tpu.memory_space<vmem>>, %arg4: memref<128x32xf32, #tpu.memory_space<vmem>>, %arg5: memref<32x128xf32, #tpu.memory_space<vmem>>, %arg6: memref<1x32xf32, #tpu.memory_space<vmem>>, %arg7: memref<1x8x32xf32, #tpu.memory_space<vmem>>) attributes {dimension_semantics = [#tpu.dimension_semantics<parallel>], iteration_bounds = array<i64: 2>, scalar_prefetch = 0 : i64, scratch_operands = 0 : i64, tpu.core_type = #tpu.core_type<tc>, window_params = [{transform_indices = @transform_0, window_bounds = array<i64: 1, 8, 32>}, {pipeline_mode = #tpu.pipeline_mode<synchronous>, transform_indices = @transform_1, window_bounds = array<i64: 128, 32>}, {pipeline_mode = #tpu.pipeline_mode<synchronous>, transform_indices = @transform_2, window_bounds = array<i64: 128, 32>}, {pipeline_mode = #tpu.pipeline_mode<synchronous>, transform_indices = @transform_3, window_bounds = array<i64: 128, 32>}, {pipeline_mode = #tpu.pipeline_mode<synchronous>, transform_indices = @transform_4, window_bounds = array<i64: 32, 128>}, {pipeline_mode = #tpu.pipeline_mode<synchronous>, transform_indices = @transform_5, window_bounds = array<i64: 1, 32>}, {transform_indices = @transform_6, window_bounds = array<i64: 1, 8, 32>}]} {
    %c0 = arith.constant 0 : index
    %c0_0 = arith.constant 0 : index
    %c0_1 = arith.constant 0 : index
    %0 = vector.load %arg1[%c0, %c0_0, %c0_1] : memref<1x8x32xf32, #tpu.memory_space<vmem>>, vector<1x8x32xf32>
    %1 = vector.shape_cast %0 : vector<1x8x32xf32> to vector<8x32xf32>
    %c0_2 = arith.constant 0 : index
    %c0_3 = arith.constant 0 : index
    %2 = vector.load %arg2[%c0_2, %c0_3] : memref<128x32xf32, #tpu.memory_space<vmem>>, vector<128x32xf32>
    %cst = arith.constant dense<0.000000e+00> : vector<8x128xf32>
    %3 = tpu.matmul %1, %2, %cst {dimension_numbers = #tpu.dot_dimension_numbers<[1], [1], [0], [0], [0, 0, 1, 0], [], []>} : vector<8x32xf32>, vector<128x32xf32>, vector<8x128xf32> -> vector<8x128xf32>
    %c0_4 = arith.constant 0 : index
    %c0_5 = arith.constant 0 : index
    %4 = vector.load %arg3[%c0_4, %c0_5] : memref<128x32xf32, #tpu.memory_space<vmem>>, vector<128x32xf32>
    %cst_6 = arith.constant dense<0.000000e+00> : vector<8x128xf32>
    %5 = tpu.matmul %1, %4, %cst_6 {dimension_numbers = #tpu.dot_dimension_numbers<[1], [1], [0], [0], [0, 0, 1, 0], [], []>} : vector<8x32xf32>, vector<128x32xf32>, vector<8x128xf32> -> vector<8x128xf32>
    %c0_7 = arith.constant 0 : index
    %c0_8 = arith.constant 0 : index
    %6 = vector.load %arg4[%c0_7, %c0_8] : memref<128x32xf32, #tpu.memory_space<vmem>>, vector<128x32xf32>
    %cst_9 = arith.constant dense<0.000000e+00> : vector<8x128xf32>
    %7 = tpu.matmul %1, %6, %cst_9 {dimension_numbers = #tpu.dot_dimension_numbers<[1], [1], [0], [0], [0, 0, 1, 0], [], []>} : vector<8x32xf32>, vector<128x32xf32>, vector<8x128xf32> -> vector<8x128xf32>
    %8 = vector.extract_strided_slice %3 {offsets = [0, 0], sizes = [8, 32], strides = [1, 1]} : vector<8x128xf32> to vector<8x32xf32>
    %9 = vector.extract_strided_slice %5 {offsets = [0, 0], sizes = [8, 32], strides = [1, 1]} : vector<8x128xf32> to vector<8x32xf32>
    %cst_10 = arith.constant dense<0.000000e+00> : vector<8x8xf32>
    %10 = tpu.matmul %8, %9, %cst_10 {dimension_numbers = #tpu.dot_dimension_numbers<[1], [1], [0], [0], [0, 0, 1, 0], [], []>} : vector<8x32xf32>, vector<8x32xf32>, vector<8x8xf32> -> vector<8x8xf32>
    %cst_11 = arith.constant dense<0xFF800000> : vector<8xf32>
    %11 = vector.multi_reduction <maximumf>, %10, %cst_11 [1] : vector<8x8xf32> to vector<8xf32>
    %12 = vector.shape_cast %11 : vector<8xf32> to vector<8x1xf32>
    %13 = vector.broadcast %12 : vector<8x1xf32> to vector<8x8xf32>
    %14 = arith.subf %10, %13 : vector<8x8xf32>
    %15 = math.exp %14 : vector<8x8xf32>
    %cst_12 = arith.constant dense<0.000000e+00> : vector<8xf32>
    %16 = vector.multi_reduction <add>, %15, %cst_12 [1] : vector<8x8xf32> to vector<8xf32>
    %17 = vector.shape_cast %16 : vector<8xf32> to vector<8x1xf32>
    %18 = vector.extract_strided_slice %7 {offsets = [0, 0], sizes = [8, 32], strides = [1, 1]} : vector<8x128xf32> to vector<8x32xf32>
    %cst_13 = arith.constant dense<0.000000e+00> : vector<8x32xf32>
    %19 = tpu.matmul %15, %18, %cst_13 {dimension_numbers = #tpu.dot_dimension_numbers<[1], [0], [0], [1], [0, 0, 1, 1], [], []>} : vector<8x8xf32>, vector<8x32xf32>, vector<8x32xf32> -> vector<8x32xf32>
    %20 = tpu.reciprocal %17 {approx = true} : vector<8x1xf32> -> vector<8x1xf32>
    %21 = vector.broadcast %20 : vector<8x1xf32> to vector<8x32xf32>
    %22 = arith.mulf %19, %21 : vector<8x32xf32>
    %23 = vector.extract_strided_slice %3 {offsets = [0, 32], sizes = [8, 32], strides = [1, 1]} : vector<8x128xf32> to vector<8x32xf32>
    %24 = vector.extract_strided_slice %5 {offsets = [0, 32], sizes = [8, 32], strides = [1, 1]} : vector<8x128xf32> to vector<8x32xf32>
    %cst_14 = arith.constant dense<0.000000e+00> : vector<8x8xf32>
    %25 = tpu.matmul %23, %24, %cst_14 {dimension_numbers = #tpu.dot_dimension_numbers<[1], [1], [0], [0], [0, 0, 1, 0], [], []>} : vector<8x32xf32>, vector<8x32xf32>, vector<8x8xf32> -> vector<8x8xf32>
    %cst_15 = arith.constant dense<0xFF800000> : vector<8xf32>
    %26 = vector.multi_reduction <maximumf>, %25, %cst_15 [1] : vector<8x8xf32> to vector<8xf32>
    %27 = vector.shape_cast %26 : vector<8xf32> to vector<8x1xf32>
    %28 = vector.broadcast %27 : vector<8x1xf32> to vector<8x8xf32>
    %29 = arith.subf %25, %28 : vector<8x8xf32>
    %30 = math.exp %29 : vector<8x8xf32>
    %cst_16 = arith.constant dense<0.000000e+00> : vector<8xf32>
    %31 = vector.multi_reduction <add>, %30, %cst_16 [1] : vector<8x8xf32> to vector<8xf32>
    %32 = vector.shape_cast %31 : vector<8xf32> to vector<8x1xf32>
    %33 = vector.extract_strided_slice %7 {offsets = [0, 32], sizes = [8, 32], strides = [1, 1]} : vector<8x128xf32> to vector<8x32xf32>
    %cst_17 = arith.constant dense<0.000000e+00> : vector<8x32xf32>
    %34 = tpu.matmul %30, %33, %cst_17 {dimension_numbers = #tpu.dot_dimension_numbers<[1], [0], [0], [1], [0, 0, 1, 1], [], []>} : vector<8x8xf32>, vector<8x32xf32>, vector<8x32xf32> -> vector<8x32xf32>
    %35 = tpu.reciprocal %32 {approx = true} : vector<8x1xf32> -> vector<8x1xf32>
    %36 = vector.broadcast %35 : vector<8x1xf32> to vector<8x32xf32>
    %37 = arith.mulf %34, %36 : vector<8x32xf32>
    %38 = vector.extract_strided_slice %3 {offsets = [0, 64], sizes = [8, 32], strides = [1, 1]} : vector<8x128xf32> to vector<8x32xf32>
    %39 = vector.extract_strided_slice %5 {offsets = [0, 64], sizes = [8, 32], strides = [1, 1]} : vector<8x128xf32> to vector<8x32xf32>
    %cst_18 = arith.constant dense<0.000000e+00> : vector<8x8xf32>
    %40 = tpu.matmul %38, %39, %cst_18 {dimension_numbers = #tpu.dot_dimension_numbers<[1], [1], [0], [0], [0, 0, 1, 0], [], []>} : vector<8x32xf32>, vector<8x32xf32>, vector<8x8xf32> -> vector<8x8xf32>
    %cst_19 = arith.constant dense<0xFF800000> : vector<8xf32>
    %41 = vector.multi_reduction <maximumf>, %40, %cst_19 [1] : vector<8x8xf32> to vector<8xf32>
    %42 = vector.shape_cast %41 : vector<8xf32> to vector<8x1xf32>
    %43 = vector.broadcast %42 : vector<8x1xf32> to vector<8x8xf32>
    %44 = arith.subf %40, %43 : vector<8x8xf32>
    %45 = math.exp %44 : vector<8x8xf32>
    %cst_20 = arith.constant dense<0.000000e+00> : vector<8xf32>
    %46 = vector.multi_reduction <add>, %45, %cst_20 [1] : vector<8x8xf32> to vector<8xf32>
    %47 = vector.shape_cast %46 : vector<8xf32> to vector<8x1xf32>
    %48 = vector.extract_strided_slice %7 {offsets = [0, 64], sizes = [8, 32], strides = [1, 1]} : vector<8x128xf32> to vector<8x32xf32>
    %cst_21 = arith.constant dense<0.000000e+00> : vector<8x32xf32>
    %49 = tpu.matmul %45, %48, %cst_21 {dimension_numbers = #tpu.dot_dimension_numbers<[1], [0], [0], [1], [0, 0, 1, 1], [], []>} : vector<8x8xf32>, vector<8x32xf32>, vector<8x32xf32> -> vector<8x32xf32>
    %50 = tpu.reciprocal %47 {approx = true} : vector<8x1xf32> -> vector<8x1xf32>
    %51 = vector.broadcast %50 : vector<8x1xf32> to vector<8x32xf32>
    %52 = arith.mulf %49, %51 : vector<8x32xf32>
    %53 = vector.extract_strided_slice %3 {offsets = [0, 96], sizes = [8, 32], strides = [1, 1]} : vector<8x128xf32> to vector<8x32xf32>
    %54 = vector.extract_strided_slice %5 {offsets = [0, 96], sizes = [8, 32], strides = [1, 1]} : vector<8x128xf32> to vector<8x32xf32>
    %cst_22 = arith.constant dense<0.000000e+00> : vector<8x8xf32>
    %55 = tpu.matmul %53, %54, %cst_22 {dimension_numbers = #tpu.dot_dimension_numbers<[1], [1], [0], [0], [0, 0, 1, 0], [], []>} : vector<8x32xf32>, vector<8x32xf32>, vector<8x8xf32> -> vector<8x8xf32>
    %cst_23 = arith.constant dense<0xFF800000> : vector<8xf32>
    %56 = vector.multi_reduction <maximumf>, %55, %cst_23 [1] : vector<8x8xf32> to vector<8xf32>
    %57 = vector.shape_cast %56 : vector<8xf32> to vector<8x1xf32>
    %58 = vector.broadcast %57 : vector<8x1xf32> to vector<8x8xf32>
    %59 = arith.subf %55, %58 : vector<8x8xf32>
    %60 = math.exp %59 : vector<8x8xf32>
    %cst_24 = arith.constant dense<0.000000e+00> : vector<8xf32>
    %61 = vector.multi_reduction <add>, %60, %cst_24 [1] : vector<8x8xf32> to vector<8xf32>
    %62 = vector.shape_cast %61 : vector<8xf32> to vector<8x1xf32>
    %63 = vector.extract_strided_slice %7 {offsets = [0, 96], sizes = [8, 32], strides = [1, 1]} : vector<8x128xf32> to vector<8x32xf32>
    %cst_25 = arith.constant dense<0.000000e+00> : vector<8x32xf32>
    %64 = tpu.matmul %60, %63, %cst_25 {dimension_numbers = #tpu.dot_dimension_numbers<[1], [0], [0], [1], [0, 0, 1, 1], [], []>} : vector<8x8xf32>, vector<8x32xf32>, vector<8x32xf32> -> vector<8x32xf32>
    %65 = tpu.reciprocal %62 {approx = true} : vector<8x1xf32> -> vector<8x1xf32>
    %66 = vector.broadcast %65 : vector<8x1xf32> to vector<8x32xf32>
    %67 = arith.mulf %64, %66 : vector<8x32xf32>
    %68 = tpu.concatenate %22, %37, %52, %67 in 1 : vector<8x32xf32>, vector<8x32xf32>, vector<8x32xf32>, vector<8x32xf32> -> vector<8x128xf32>
    %c0_26 = arith.constant 0 : index
    %c0_27 = arith.constant 0 : index
    %69 = vector.load %arg5[%c0_26, %c0_27] : memref<32x128xf32, #tpu.memory_space<vmem>>, vector<32x128xf32>
    %cst_28 = arith.constant dense<0.000000e+00> : vector<8x32xf32>
    %70 = tpu.matmul %68, %69, %cst_28 {dimension_numbers = #tpu.dot_dimension_numbers<[1], [1], [0], [0], [0, 0, 1, 0], [], []>} : vector<8x128xf32>, vector<32x128xf32>, vector<8x32xf32> -> vector<8x32xf32>
    %c0_29 = arith.constant 0 : index
    %c0_30 = arith.constant 0 : index
    %71 = vector.load %arg6[%c0_29, %c0_30] : memref<1x32xf32, #tpu.memory_space<vmem>>, vector<1x32xf32>
    %72 = vector.broadcast %71 : vector<1x32xf32> to vector<8x32xf32>
    %73 = arith.addf %70, %72 : vector<8x32xf32>
    %c0_31 = arith.constant 0 : index
    %c0_32 = arith.constant 0 : index
    %c0_33 = arith.constant 0 : index
    %74 = vector.load %arg7[%c0_31, %c0_32, %c0_33] : memref<1x8x32xf32, #tpu.memory_space<vmem>>, vector<1x8x32xf32>
    %75 = vector.shape_cast %74 : vector<1x8x32xf32> to vector<8x32xf32>
    %76 = vector.shape_cast %73 : vector<8x32xf32> to vector<1x8x32xf32>
    tpu.vector_store %arg7[%c0_31, %c0_32, %c0_33], %76 {strides = array<i32>} : memref<1x8x32xf32, #tpu.memory_space<vmem>>, vector<1x8x32xf32>,
    return
  }
  func.func @transform_0(%arg0: i32) -> (i32, i32, i32) {
    %c0_i32 = arith.constant 0 : i32
    %c0_i32_0 = arith.constant 0 : i32
    %c0_i32_1 = arith.constant 0 : i32
    return %arg0, %c0_i32, %c0_i32_0 : i32, i32, i32
  }
  func.func @transform_1(%arg0: i32) -> (i32, i32) {
    %c0_i32 = arith.constant 0 : i32
    %c0_i32_0 = arith.constant 0 : i32
    %c0_i32_1 = arith.constant 0 : i32
    return %c0_i32, %c0_i32_0 : i32, i32
  }
  func.func @transform_2(%arg0: i32) -> (i32, i32) {
    %c0_i32 = arith.constant 0 : i32
    %c0_i32_0 = arith.constant 0 : i32
    %c0_i32_1 = arith.constant 0 : i32
    return %c0_i32, %c0_i32_0 : i32, i32
  }
  func.func @transform_3(%arg0: i32) -> (i32, i32) {
    %c0_i32 = arith.constant 0 : i32
    %c0_i32_0 = arith.constant 0 : i32
    %c0_i32_1 = arith.constant 0 : i32
    return %c0_i32, %c0_i32_0 : i32, i32
  }
  func.func @transform_4(%arg0: i32) -> (i32, i32) {
    %c0_i32 = arith.constant 0 : i32
    %c0_i32_0 = arith.constant 0 : i32
    %c0_i32_1 = arith.constant 0 : i32
    return %c0_i32, %c0_i32_0 : i32, i32
  }
  func.func @transform_5(%arg0: i32) -> (i32, i32) {
    %c0_i32 = arith.constant 0 : i32
    %c0_i32_0 = arith.constant 0 : i32
    %c0_i32_1 = arith.constant 0 : i32
    return %c0_i32, %c0_i32_0 : i32, i32
  }
  func.func @transform_6(%arg0: i32) -> (i32, i32, i32) {
    %c0_i32 = arith.constant 0 : i32
    %c0_i32_0 = arith.constant 0 : i32
    %c0_i32_1 = arith.constant 0 : i32
    return %arg0, %c0_i32, %c0_i32_0 : i32, i32, i32
  }
}

</mosaic_0001>

<bundles_post_ra>
// kernel: tpu_custom_call.1
= control target key start
LH: loop header
LB: loop body
LE: loop exit
PB: predicated region body
PF: predicated region fallthrough
CT: control target
= control target key end

     0   :  { %11 = vsyncpa [#allocation3], 0  ;;  %s2469_s0 = inlined_call_operand.vmem [shape: f32[2,8,32], index: 0, kind: input, shape index: {}]   ;;  %s2470_s1 = inlined_call_operand.vmem [shape: f32[128,32], index: 1, kind: input, shape index: {}]   ;;  %s2471_s2 = inlined_call_operand.vmem [shape: f32[128,32], index: 2, kind: input, shape index: {}]   ;;  %s2472_s3 = inlined_call_operand.vmem [shape: f32[128,32], index: 3, kind: input, shape index: {}]   ;;  %s2473_s4 = inlined_call_operand.vmem [shape: f32[32,128], index: 4, kind: input, shape index: {}]   ;;  %s2474_s5 = inlined_call_operand.vmem [shape: f32[1,32], index: 5, kind: input, shape index: {}]   ;;  %s2475_s6 = inlined_call_operand.hbm [shape: f32[2,8,32], index: 6, kind: output, shape index: {}]  }
   0x1   :  { %13 = vsyncpa [#allocation3 + $0x1], 0  ;;  %s2054_s21 = smov 0   ;;  %s2056_s22 = smov 0  }
   0x2   :  { %s2058_s23 = smov 0   ;;  %s2060_s24 = smov 0  }
   0x3 LB: > { %s2075_s25 = sadd.s32 4294967295, %s2010_s24   ;;  %s1483_s26 = sadd.s32 4294967294, %s2010_s24   ;;  %s2010_s24 = sphi %s2060_s24, %s2483_s24   ;;  %s2006_s23 = sphi %s2058_s23, %s2482_s23   ;;  %s2002_s22 = sphi %s2056_s22, %s2481_s22   ;;  %s1998_s21 = sphi %s2054_s21, %s2480_s21  }
   0x4   : > { %s2079_s27 = sadd.s32 1, %s2010_s24   ;;  %s157_s28 = sadd.s32 1, %s2006_s23 }
   0x5   : > { %s154_s29 = ssub.s32 %s2010_s24, %s2079_s27  ;;  %p167_p0 = scmp.ne.s32.totalorder %s2006_s23, %s2002_s22 }
   0x6   : > { %p155_p1 = scmp.eq.s32.totalorder %s154_s29, 0  ;;  %p168_p2 = scmp.eq.s32.totalorder %s2075_s25, 1 }
   0x7   : > { %p173_p3 = scmp.ne.s32.totalorder %s2002_s22, %s1998_s21  ;;  %p174_p4 = scmp.eq.s32.totalorder %s1483_s26, 1 }
   0x8   : > { %s2090_s30 = scalar_select %p155_p1, %s2006_s23, %s157_s28  }
   0x9   : > { %p2092_p5 = por %p168_p2, %p167_p0  ;;  %p2096_p6 = por %p174_p4, %p173_p3 }
   0xa   : > { %p1486_p7 = scmp.ge.s32.totalorder %s2010_s24, 1  ;;  %p214_p8 = scmp.lt.s32.totalorder %s2010_s24, 3 }
   0xc   : > { %p215_p9 = pnand %p1486_p7, %p214_p8 }
   0xd   : > { %vm264_vm0 = vcmask (!%p215_p9), 261120   ;;  %v386_v0 = vld [vmem:[%s2471_s2] sm:$0xff] (!%p215_p9)  ;;  %v387_v1 = vld [vmem:[%s2471_s2 + $0x8] sm:$0xff] (!%p215_p9)  ;;  %v2012_v3 = vmov (!%p215_p9), 0.0|0.0   ;;  %vm2013_vm2 = vmmov (!%p215_p9), 0   ;;  %v2014_v8 = vmov (!%p215_p9), 0.0  }
   0xe   : > { %218 = sbr.rel (%p215_p9) target bundleno = 2344 (0x928), region = 44  ;;  %v248_v2 = vld [vmem:[%s2470_s1] sm:$0xff] (!%p215_p9)  ;;  %1817 = vmatprep.subr.bf16.mxu1 (!%p215_p9), %v2012_v3  ;;  %vm2114_vm1 = vmpackc.low (!%p215_p9), %vm264_vm0, %vm264_vm0  ;;  %v1818_v5 = vpack.c.bf16 (!%p215_p9), %v387_v1, %v386_v0  ;;  %1785 = vmatprep.subr.bf16.mxu0 (!%p215_p9), %v2012_v3  ;;  %v249_v6 = vld [vmem:[%s2470_s1 + $0x8] sm:$0xff] (!%p215_p9)  ;;  %p243_p10 = scmp.lt.s32.totalorder (!%p215_p9), %s2075_s25, 1  ;;  %vm730_vm3 = vcmask (!%p215_p9), 64512   ;;  %vm1324_vm4 = vcmask (!%p215_p9), 523264  }
   0xf   : > { %v1786_v7 = vpack.c.bf16 (!%p215_p9), %v249_v6, %v248_v2  ;;  %1696 = vmatprep.mubr.msk.f32.mxu1 (!%p215_p9), %vm2013_vm2, %v2014_v8  ;;  %1661 = vmatprep.mubr.msk.f32.mxu0 (!%p215_p9), %vm2013_vm2, %v2014_v8  ;;  %v388_v9 = vld [vmem:[%s2471_s2 + $0x10] sm:$0xff] (!%p215_p9)  ;;  %v389_v10 = vld [vmem:[%s2471_s2 + $0x18] sm:$0xff] (!%p215_p9)  ;;  %v390_v15 = vld [vmem:[%s2471_s2 + $0x20] sm:$0xff] (!%p215_p9)  ;;  %s2015_s20 = smov (!%p215_p9), 96   ;;  %s2016_s26 = smov (!%p215_p9), 64   ;;  %vm1326_vm5 = vcmask (!%p215_p9), 785408  }
  0x10   : > { %1820 = vmatpush3.bf16.xpose.msk.msra.mxu1 (!%p215_p9), %vm2114_vm1, %v1818_v5  ;;  %v250_v11 = vld [vmem:[%s2470_s1 + $0x10] sm:$0xff] (!%p215_p9)  ;;  %v251_v12 = vld [vmem:[%s2470_s1 + $0x18] sm:$0xff] (!%p215_p9)  ;;  %v1822_v13 = vpack.c.bf16 (!%p215_p9), %v389_v10, %v388_v9  ;;  %v391_v16 = vld [vmem:[%s2471_s2 + $0x28] sm:$0xff] (!%p215_p9)  ;;  %s2017_s28 = smov (!%p215_p9), 32   ;;  %s240_s16 = sand.u32 (!%p215_p9), 1, %s2002_s22  }
  0x11   : > { %1788 = vmatpush3.bf16.xpose.msk.msra.mxu0 (!%p215_p9), %vm2114_vm1, %v1786_v7  ;;  %1821 = vmatprep.subr.bf16.mxu1 (!%p215_p9), %v2012_v3  ;;  %v1790_v14 = vpack.c.bf16 (!%p215_p9), %v251_v12, %v250_v11  ;;  %v252_v17 = vld [vmem:[%s2470_s1 + $0x20] sm:$0xff] (!%p215_p9)  ;;  %v253_v18 = vld [vmem:[%s2470_s1 + $0x28] sm:$0xff] (!%p215_p9)  ;;  %v1826_v19 = vpack.c.bf16 (!%p215_p9), %v391_v16, %v390_v15  ;;  %v392_v21 = vld [vmem:[%s2471_s2 + $0x30] sm:$0xff] (!%p215_p9)  ;;  %s1411_s11 = scalar_lea.sflag (!%p215_p9), [#allocation3], %s240_s16 }
  0x12   : > { %1789 = vmatprep.subr.bf16.mxu0 (!%p215_p9), %v2012_v3  ;;  %v1794_v20 = vpack.c.bf16 (!%p215_p9), %v253_v18, %v252_v17  ;;  %v393_v22 = vld [vmem:[%s2471_s2 + $0x38] sm:$0xff] (!%p215_p9)  ;;  %v254_v23 = vld [vmem:[%s2470_s1 + $0x30] sm:$0xff] (!%p215_p9)  ;;  %v394_v27 = vld [vmem:[%s2471_s2 + $0x40] sm:$0xff] (!%p215_p9) }
  0x13   : > { %v255_v24 = vld [vmem:[%s2470_s1 + $0x38] sm:$0xff] (!%p215_p9)  ;;  %v1830_v25 = vpack.c.bf16 (!%p215_p9), %v393_v22, %v392_v21  ;;  %v395_v28 = vld [vmem:[%s2471_s2 + $0x48] sm:$0xff] (!%p215_p9)  ;;  %v256_v29 = vld [vmem:[%s2470_s1 + $0x40] sm:$0xff] (!%p215_p9) }
  0x14   : > { %v1798_v26 = vpack.c.bf16 (!%p215_p9), %v255_v24, %v254_v23  ;;  %v257_v30 = vld [vmem:[%s2470_s1 + $0x48] sm:$0xff] (!%p215_p9)  ;;  %v1834_v31 = vpack.c.bf16 (!%p215_p9), %v395_v28, %v394_v27  ;;  %v396_v33 = vld [vmem:[%s2471_s2 + $0x50] sm:$0xff] (!%p215_p9)  ;;  %v397_v34 = vld [vmem:[%s2471_s2 + $0x58] sm:$0xff] (!%p215_p9) }
  0x15   : > { %v1802_v32 = vpack.c.bf16 %v257_v30, %v256_v29  ;;  %v258_v35 = vld [vmem:[%s2470_s1 + $0x50] sm:$0xff]  ;;  %v259_v36 = vld [vmem:[%s2470_s1 + $0x58] sm:$0xff]  ;;  %v1838_v37 = vpack.c.bf16 %v397_v34, %v396_v33  ;;  %v398_v39 = vld [vmem:[%s2471_s2 + $0x60] sm:$0xff]  ;;  %s244_s13 = scalar_select %p243_p10, %s2075_s25, 1 }
  0x16   : > { %v1806_v38 = vpack.c.bf16 %v259_v36, %v258_v35  ;;  %v399_v40 = vld [vmem:[%s2471_s2 + $0x68] sm:$0xff]  ;;  %v260_v41 = vld [vmem:[%s2470_s1 + $0x60] sm:$0xff]  ;;  %v400_v45 = vld [vmem:[%s2471_s2 + $0x70] sm:$0xff] }
  0x17   : > { %v261_v42 = vld [vmem:[%s2470_s1 + $0x68] sm:$0xff]  ;;  %v1842_v43 = vpack.c.bf16 %v399_v40, %v398_v39  ;;  %v401_v46 = vld [vmem:[%s2471_s2 + $0x78] sm:$0xff]  ;;  %v262_v47 = vld [vmem:[%s2470_s1 + $0x70] sm:$0xff]  ;;  %s1488_s14 = sshll.u32 %s244_s13, 3 }
  0x18   : > { %1824 = vmatpush3.bf16.xpose.msk.msra.mxu1 %vm2114_vm1, %v1822_v13  ;;  %v1810_v44 = vpack.c.bf16 %v261_v42, %v260_v41  ;;  %v263_v48 = vld [vmem:[%s2470_s1 + $0x78] sm:$0xff]  ;;  %v1846_v49 = vpack.c.bf16 %v401_v46, %v400_v45  ;;  %s246_s17 = scalar_lea.vmem %s2469_s0, %s1488_s14  ;;  %v520_v51 = vld [vmem:[%s2472_s3] sm:$0xff]  ;;  %v521_v52 = vld [vmem:[%s2472_s3 + $0x8] sm:$0xff] }
  0x19   : > { %1792 = vmatpush3.bf16.xpose.msk.msra.mxu0 %vm2114_vm1, %v1790_v14  ;;  %1825 = vmatprep.subr.bf16.mxu1 %v2012_v3  ;;  %v1814_v50 = vpack.c.bf16 %v263_v48, %v262_v47  ;;  %v247_v53 = vld [vmem:[%s246_s17] sm:$0xff]  ;;  %v1850_v54 = vpack.c.bf16 %v521_v52, %v520_v51  ;;  %v522_v55 = vld [vmem:[%s2472_s3 + $0x10] sm:$0xff]  ;;  %v523_v56 = vld [vmem:[%s2472_s3 + $0x18] sm:$0xff]  ;;  %s1487_s17 = sshll.u32 %s240_s16, 3 }
  0x1a   : > { %1793 = vmatprep.subr.bf16.mxu0 %v2012_v3  ;;  %v1854_v57 = vpack.c.bf16 %v523_v56, %v522_v55  ;;  %v524_v58 = vld [vmem:[%s2472_s3 + $0x20] sm:$0xff]  ;;  %v525_v59 = vld [vmem:[%s2472_s3 + $0x28] sm:$0xff]  ;;  %v526_v61 = vld [vmem:[%s2472_s3 + $0x30] sm:$0xff] }
  0x1b   : > { %v1858_v60 = vpack.c.bf16 %v525_v59, %v524_v58  ;;  %v527_v62 = vld [vmem:[%s2472_s3 + $0x38] sm:$0xff]  ;;  %v528_v0 = vld [vmem:[%s2472_s3 + $0x40] sm:$0xff]  ;;  %v529_v1 = vld [vmem:[%s2472_s3 + $0x48] sm:$0xff] }
  0x1c   : > { %v1862_v63 = vpack.c.bf16 %v527_v62, %v526_v61  ;;  %v1866_v2 = vpack.c.bf16 %v529_v1, %v528_v0  ;;  %v530_v5 = vld [vmem:[%s2472_s3 + $0x50] sm:$0xff]  ;;  %v531_v6 = vld [vmem:[%s2472_s3 + $0x58] sm:$0xff]  ;;  %v532_v9 = vld [vmem:[%s2472_s3 + $0x60] sm:$0xff] }
  0x1d   : > { %v1870_v7 = vpack.c.bf16 %v531_v6, %v530_v5  ;;  %v533_v10 = vld [vmem:[%s2472_s3 + $0x68] sm:$0xff]  ;;  %v534_v12 = vld [vmem:[%s2472_s3 + $0x70] sm:$0xff]  ;;  %v535_v13 = vld [vmem:[%s2472_s3 + $0x78] sm:$0xff] }
  0x1e   : > { %v1874_v11 = vpack.c.bf16 %v533_v10, %v532_v9  ;;  %v1878_v14 = vpack.c.bf16 %v535_v13, %v534_v12  ;;  %v1328_v12 = vld [vmem:[%s2473_s4] sm:$0xff] }
  0x20   : > { %1828 = vmatpush3.bf16.xpose.msk.msra.mxu1 %vm2114_vm1, %v1826_v19 }
  0x21   : > { %1796 = vmatpush3.bf16.xpose.msk.msra.mxu0 %vm2114_vm1, %v1794_v20  ;;  %1829 = vmatprep.subr.bf16.mxu1 %v2012_v3 }
  0x22   : > { %1797 = vmatprep.subr.bf16.mxu0 %v2012_v3 }
  0x28   : > { %1832 = vmatpush3.bf16.xpose.msk.msra.mxu1 %vm2114_vm1, %v1830_v25 }
  0x29   : > { %1800 = vmatpush3.bf16.xpose.msk.msra.mxu0 %vm2114_vm1, %v1798_v26  ;;  %1833 = vmatprep.subr.bf16.mxu1 %v2012_v3 }
  0x2a   : > { %1801 = vmatprep.subr.bf16.mxu0 %v2012_v3 }
  0x30   : > { %1836 = vmatpush3.bf16.xpose.msk.msra.mxu1 %vm2114_vm1, %v1834_v31 }
  0x31   : > { %1804 = vmatpush3.bf16.xpose.msk.msra.mxu0 %vm2114_vm1, %v1802_v32  ;;  %1837 = vmatprep.subr.bf16.mxu1 %v2012_v3 }
  0x32   : > { %1805 = vmatprep.subr.bf16.mxu0 %v2012_v3 }
  0x38   : > { %1840 = vmatpush3.bf16.xpose.msk.msra.mxu1 %vm2114_vm1, %v1838_v37 }
  0x39   : > { %1808 = vmatpush3.bf16.xpose.msk.msra.mxu0 %vm2114_vm1, %v1806_v38  ;;  %1841 = vmatprep.subr.bf16.mxu1 %v2012_v3 }
  0x3a   : > { %1809 = vmatprep.subr.bf16.mxu0 %v2012_v3 }
  0x40   : > { %1844 = vmatpush3.bf16.xpose.msk.msra.mxu1 %vm2114_vm1, %v1842_v43 }
  0x41   : > { %1812 = vmatpush3.bf16.xpose.msk.msra.mxu0 %vm2114_vm1, %v1810_v44  ;;  %1845 = vmatprep.subr.bf16.mxu1 %v2012_v3 }
  0x42   : > { %1813 = vmatprep.subr.bf16.mxu0 %v2012_v3 }
  0x48   : > { %1848 = vmatpush3.bf16.xpose.msk.msra.mxu1 %vm2114_vm1, %v1846_v49 }
  0x49   : > { %1816 = vmatpush3.bf16.xpose.msk.msra.mxu0 %vm2114_vm1, %v1814_v50  ;;  %1734 = vmatprep.subr.mxu1 %v2014_v8 }
  0x4a   : > { %1849 = vmatprep.subr.bf16.mxu0 %v2012_v3 }
  0x4f   : > { %1697 = vmatmul.mubr.msk.f32.vlgmr.msra.gmra.mrb[0].mxu1 %vm264_vm0, %v247_v53 }
  0x50   : > { %1662 = vmatmul.mubr.msk.f32.vlgmr.msra.gmra.mrb[0].mxu0 %vm264_vm0, %v247_v53  ;;  %1736 = vmatprep.mubr.msk.f32.mxu1 %vm2013_vm2, %v2014_v8 }
  0x51   : > { %1852 = vmatpush3.bf16.xpose.msk.msra.mxu0 %vm2114_vm1, %v1850_v54  ;;  %1731 = vmatprep.mubr.msk.f32.mxu0 %vm2013_vm2, %v2014_v8 }
  0x52   : > { %1853 = vmatprep.subr.bf16.mxu0 %v2012_v3 }
  0x59   : > { %1856 = vmatpush3.bf16.xpose.msk.msra.mxu0 %vm2114_vm1, %v1854_v57 }
  0x5a   : > { %1857 = vmatprep.subr.bf16.mxu0 %v2012_v3 }
  0x61   : > { %1860 = vmatpush3.bf16.xpose.msk.msra.mxu0 %vm2114_vm1, %v1858_v60 }
  0x62   : > { %1861 = vmatprep.subr.bf16.mxu0 %v2012_v3 }
  0x69   : > { %1864 = vmatpush3.bf16.xpose.msk.msra.mxu0 %vm2114_vm1, %v1862_v63 }
  0x6a   : > { %1865 = vmatprep.subr.bf16.mxu0 %v2012_v3 }
  0x71   : > { %1868 = vmatpush3.bf16.xpose.msk.msra.mxu0 %vm2114_vm1, %v1866_v2 }
  0x72   : > { %1869 = vmatprep.subr.bf16.mxu0 %v2012_v3 }
  0x79   : > { %1872 = vmatpush3.bf16.xpose.msk.msra.mxu0 %vm2114_vm1, %v1870_v7 }
  0x7a   : > { %1873 = vmatprep.subr.bf16.mxu0 %v2012_v3 }
  0x81   : > { %1876 = vmatpush3.bf16.xpose.msk.msra.mxu0 %vm2114_vm1, %v1874_v11 }
  0x82   : > { %1877 = vmatprep.subr.bf16.mxu0 %v2012_v3 }
  0x89   : > { %1880 = vmatpush3.bf16.xpose.msk.msra.mxu0 %vm2114_vm1, %v1878_v14  ;;  %v1330_v14 = vld [vmem:[%s2473_s4 + $0x10] sm:$0xff] }
  0x90   : > { %1732 = vmatmul.mubr.msk.f32.vlgmr.msra.gmra.mrb[2].mxu0 %vm264_vm0, %v247_v53 }
 0x122   : > { %v516_v15 = vpop.f32.mrb[0].mxu1 }
 0x123   : > { %v1698_v16 = vpop.f32.mrb[1].mxu1  ;;  %1735 = vmatpush3.xpose.msk.msra.mxu1 %vm264_vm0, %v516_v15  ;;  %v382_v17 = vpop.f32.mrb[0].mxu0 }
 0x124   : > { %v1663_v18 = vpop.f32.mrb[1].mxu0  ;;  %815 = vrot.lane.b32.xlu1 %v382_v17, %s2015_s20  ;;  %1739 = vmatprep.subr.mxu1 %v2014_v8 }
 0x126   : > { %1737 = vmatmul.mubr.msk.f32.vlgmr.msra.gmra.mrb[2].mxu1 %vm264_vm0, %v382_v17 }
 0x127   : > { %1741 = vmatprep.mubr.msk.f32.mxu1 %vm2013_vm2, %v2014_v8 }
 0x163   : > { %v650_v4 = vpop.f32.mrb[2].mxu0 }
 0x164   : > { %v1733_v19 = vpop.f32.mrb[3].mxu0  ;;  %1740 = vmatpush3.msra.mxu1 %v650_v4 }
 0x165   : > { %1744 = vmatprep.subr.mxu1 %v2014_v8 }
 0x196   : > { %v816_v28 = vpop.permute.xlu1 %815 }
 0x1f9   : > { %v726_v20 = vpop.f32.mrb[2].mxu1 }
 0x1fa   : > { %v1738_v21 = vpop.f32.mrb[3].mxu1  ;;  %v731_v22 = vsel %vm730_vm3, %v726_v20, -inf }
 0x1fb   : > { %732 = vmax.xlane.f32.xlu0 %v731_v22 }
 0x211   : > { %817 = vrot.lane.b32.xlu0 %v516_v15, %s2015_s20 }
 0x215   : > { %903 = vrot.lane.b32.xlu0 %v650_v4, %s2015_s20 }
 0x219   : > { %983 = vrot.lane.b32.xlu0 %v516_v15, %s2016_s26 }
 0x21d   : > { %981 = vrot.lane.b32.xlu0 %v382_v17, %s2016_s26 }
 0x288   : > { %v733_v23 = vpop.xlane.xlu0 %732 }
 0x289   : > { %v734_v24 = vsub.f32 %v726_v20, %v733_v23 }
 0x28b   : > { %v735_v25 = vmul.f32 1.442695, %v734_v24 }
 0x28c   : > { %v818_v26 = vpop.permute.xlu0 %817 }
 0x28d   : > { %1932 = vpow2.f32 %v735_v25 }
 0x290   : > { %v904_v29 = vpop.permute.xlu0 %903 }
 0x294   : > { %v984_v38 = vpop.permute.xlu0 %983 }
 0x297   : > { %v2353_v27 = vpop.eup %1932 }
 0x298   : > { %1742 = vmatmul.mubr.msk.f32.vlgmr.msra.gmra.mrb[4].mxu1 %vm730_vm3, %v2353_v27  ;;  %v982_v40 = vpop.permute.xlu0 %981  ;;  %v737_v9 = vsel %vm730_vm3, %v2353_v27, 0.0 }
 0x299   : > { %1745 = vmatpush3.xpose.msk.msra.mxu1 %vm264_vm0, %v818_v26  ;;  %1746 = vmatprep.mubr.msk.f32.mxu1 %vm2013_vm2, %v2014_v8 }
 0x29a   : > { %1749 = vmatprep.subr.mxu1 %v2014_v8 }
 0x29c   : > { %1747 = vmatmul.mubr.msk.f32.vlgmr.msra.gmra.mrb[6].mxu1 %vm264_vm0, %v816_v28 }
 0x29d   : > { %1750 = vmatpush3.msra.mxu1 %v904_v29  ;;  %1751 = vmatprep.mubr.msk.f32.mxu1 %vm2013_vm2, %v2014_v8  ;;  %v1552_v29 = vld [vmem:[%s2474_s5] ss:$0 sm:$0xff] }
 0x29e   : > { %1754 = vmatprep.subr.mxu1 %v2014_v8 }
 0x36b   : > { %v2365_v30 = vpop.f32.mrb[4].mxu1 }
 0x36c   : > { %v1743_v31 = vpop.f32.mrb[5].mxu1 }
 0x36f   : > { %v889_v32 = vpop.f32.mrb[6].mxu1 }
 0x370   : > { %v1748_v33 = vpop.f32.mrb[7].mxu1  ;;  %v893_v34 = vsel %vm730_vm3, %v889_v32, -inf }
 0x371   : > { %894 = vmax.xlane.f32.xlu1 %v893_v34 }
 0x382   : > { %1068 = vrot.lane.b32.xlu1 %v650_v4, %s2016_s26 }
 0x386   : > { %1148 = vrot.lane.b32.xlu1 %v516_v15, %s2017_s28  ;;  %v1331_v15 = vld [vmem:[%s2473_s4 + $0x18] sm:$0xff] }
 0x387   : > { %v1885_v16 = vpack.c.bf16 %v1331_v15, %v1330_v14 }
 0x38a   : > { %1146 = vrot.lane.b32.xlu1 %v382_v17, %s2017_s28 }
 0x3fe   : > { %v895_v35 = vpop.xlane.xlu1 %894 }
 0x3ff   : > { %v896_v36 = vsub.f32 %v889_v32, %v895_v35 }
 0x401   : > { %v897_v37 = vmul.f32 1.442695, %v896_v36 }
 0x402   : > { %v1069_v41 = vpop.permute.xlu1 %1068 }
 0x403   : > { %1934 = vpow2.f32 %v897_v37 }
 0x406   : > { %v1149_v51 = vpop.permute.xlu1 %1148 }
 0x40a   : > { %v1147_v53 = vpop.permute.xlu1 %1146 }
 0x40d   : > { %v1935_v39 = vpop.eup %1934 }
 0x40e   : > { %1752 = vmatmul.mubr.msk.f32.vlgmr.msra.gmra.mrb[8].mxu1 %vm730_vm3, %v1935_v39  ;;  %v899_v47 = vsel %vm730_vm3, %v1935_v39, 0.0 }
 0x40f   : > { %1755 = vmatpush3.xpose.msk.msra.mxu1 %vm264_vm0, %v984_v38  ;;  %1756 = vmatprep.mubr.msk.f32.mxu1 %vm2013_vm2, %v2014_v8 }
 0x410   : > { %1759 = vmatprep.subr.mxu1 %v2014_v8 }
 0x412   : > { %1757 = vmatmul.mubr.msk.f32.vlgmr.msra.gmra.mrb[10].mxu1 %vm264_vm0, %v982_v40 }
 0x413   : > { %1760 = vmatpush3.msra.mxu1 %v1069_v41  ;;  %1761 = vmatprep.mubr.msk.f32.mxu1 %vm2013_vm2, %v2014_v8 }
 0x414   : > { %1764 = vmatprep.subr.mxu1 %v2014_v8 }
 0x4e1   : > { %v975_v42 = vpop.f32.mrb[8].mxu1 }
 0x4e2   : > { %v1753_v43 = vpop.f32.mrb[9].mxu1 }
 0x4e5   : > { %v1055_v44 = vpop.f32.mrb[10].mxu1 }
 0x4e6   : > { %v1758_v45 = vpop.f32.mrb[11].mxu1  ;;  %v1059_v46 = vsel %vm730_vm3, %v1055_v44, -inf }
 0x4e7   : > { %1060 = vmax.xlane.f32.xlu0 %v1059_v46 }
 0x4fd   : > { %1233 = vrot.lane.b32.xlu0 %v650_v4, %s2017_s28 }
 0x51c   : > { %900 = vadd.xlane.f32.xlu0 %v899_v47 }
 0x574   : > { %v1061_v48 = vpop.xlane.xlu0 %1060 }
 0x575   : > { %v1062_v49 = vsub.f32 %v1055_v44, %v1061_v48 }
 0x577   : > { %v1063_v50 = vmul.f32 1.442695, %v1062_v49 }
 0x578   : > { %v1234_v54 = vpop.permute.xlu0 %1233 }
 0x579   : > { %1936 = vpow2.f32 %v1063_v50 }
 0x583   : > { %v1937_v52 = vpop.eup %1936 }
 0x584   : > { %1762 = vmatmul.mubr.msk.f32.vlgmr.msra.gmra.mrb[12].mxu1 %vm730_vm3, %v1937_v52  ;;  %v1065_v60 = vsel %vm730_vm3, %v1937_v52, 0.0 }
 0x585   : > { %1765 = vmatpush3.xpose.msk.msra.mxu1 %vm264_vm0, %v1149_v51  ;;  %1766 = vmatprep.mubr.msk.f32.mxu1 %vm2013_vm2, %v2014_v8 }
 0x586   : > { %1769 = vmatprep.subr.mxu1 %v2014_v8 }
 0x588   : > { %1767 = vmatmul.mubr.msk.f32.vlgmr.msra.gmra.mrb[14].mxu1 %vm264_vm0, %v1147_v53 }
 0x589   : > { %1770 = vmatpush3.msra.mxu1 %v1234_v54  ;;  %1771 = vmatprep.mubr.msk.f32.mxu1 %vm2013_vm2, %v2014_v8 }
 0x58a   : > { %1881 = vmatprep.subr.bf16.mxu1 %v2012_v3 }
 0x5a9   : > { %v901_v7 = vpop.xlane.xlu0 %900 }
 0x657   : > { %v1140_v55 = vpop.f32.mrb[12].mxu1 }
 0x658   : > { %v1763_v56 = vpop.f32.mrb[13].mxu1 }
 0x65b   : > { %v1220_v57 = vpop.f32.mrb[14].mxu1 }
 0x65c   : > { %v1768_v58 = vpop.f32.mrb[15].mxu1  ;;  %v1224_v59 = vsel %vm730_vm3, %v1220_v57, -inf }
 0x65d   : > { %1225 = vmax.xlane.f32.xlu1 %v1224_v59 }
 0x661   : > { %1066 = vadd.xlane.f32.xlu1 %v1065_v60 }
 0x6ea   : > { %v1226_v61 = vpop.xlane.xlu1 %1225 }
 0x6eb   : > { %v1227_v62 = vsub.f32 %v1220_v57, %v1226_v61 }
 0x6ed   : > { %v1228_v63 = vmul.f32 1.442695, %v1227_v62 }
 0x6ee   : > { %v1067_v0 = vpop.xlane.xlu1 %1066 }
 0x6ef   : > { %1938 = vpow2.f32 %v1228_v63 }
 0x6f0   : > { %1940 = vrcp.f32 %v1067_v0 }
 0x6f1   : > { %1942 = vrcp.f32 %v901_v7 }
 0x6f9   : > { %v1939_v1 = vpop.eup %1938 }
 0x6fa   : > { %v1941_v2 = vpop.eup %1940  ;;  %1772 = vmatmul.mubr.msk.f32.vlgmr.msra.gmra.mrb[16].mxu1 %vm730_vm3, %v1939_v1  ;;  %v1230_v5 = vsel %vm730_vm3, %v1939_v1, 0.0 }
 0x6fb   : > { %1231 = vadd.xlane.f32.xlu1 %v1230_v5  ;;  %v1145_v6 = vmul.f32 %v1941_v2, %v1140_v55  ;;  %1782 = vmatprep.mubr.msk.f32.mxu1 %vm2013_vm2, %v2014_v8  ;;  %v1943_v10 = vpop.eup %1942  ;;  %v1329_v8 = vld [vmem:[%s2473_s4 + $0x8] sm:$0xff] }
 0x6fc   : > { %v980_v11 = vmul.f32 %v1943_v10, %v975_v42  ;;  %v1882_v13 = vpack.c.bf16 %v1329_v8, %v1328_v12 }
 0x6fd   : > { %1316 = vrot.lane.b32.xlu0 %v1145_v6, %s2016_s26  ;;  %s242_s26 = scalar_lea.vmem [#allocation2], %s1487_s17 }
 0x6fe   : > { %1883 = vmatpush3.bf16.xpose.msra.mxu1 %v1882_v13 }
 0x6ff   : > { %738 = vadd.xlane.f32.xlu1 %v737_v9  ;;  %1884 = vmatprep.subr.bf16.mxu1 %v2012_v3 }
 0x706   : > { %1886 = vmatpush3.bf16.xpose.msra.mxu1 %v1885_v16 }
 0x710   : > { %1312 = vrot.lane.b32.xlu1 %v980_v11, %s2017_s28  ;;  %s1424_s28 = sshll.u32 %s242_s26, 4  ;;  %s2428_s28 = int_to_ptr.vmem [resolvable:$true] %s1424_s28 }
 0x711   : > { %s1948_s12 = scalar_lea.vmem %s2428_s28, 128 }
 0x712   : > { %p1949_p11 = scmp.ne.s32.totalorder %s2428_s28, %s1948_s12 }
 0x714   : > { %p1950_p12 = pnand %p1949_p11, %p2092_p5 }
 0x716   : > { %p1951_p13 = pneg %p1950_p12 }
 0x76f   : > { %v1317_v25 = vpop.permute.xlu0 %1316 }
 0x788   : > { %v1232_v17 = vpop.xlane.xlu1 %1231 }
 0x789   : > { %1944 = vrcp.f32 %v1232_v17 }
 0x78c   : > { %v739_v3 = vpop.xlane.xlu1 %738 }
 0x78d   : > { %1946 = vrcp.f32 %v739_v3 }
 0x790   : > { %v1313_v23 = vpop.permute.xlu1 %1312 }
 0x793   : > { %v1945_v18 = vpop.eup %1944 }
 0x797   : > { %v1947_v21 = vpop.eup %1946 }
 0x798   : > { %v814_v22 = vmul.f32 %v1947_v21, %v2365_v30 }
 0x79a   : > { %v1323_v24 = vsel %vm264_vm0, %v814_v22, %v1313_v23 }
 0x79b   : > { %v1325_v26 = vsel %vm1324_vm4, %v1323_v24, %v1317_v25 }
 0x7cd   : > { %v1305_v4 = vpop.f32.mrb[16].mxu1 }
 0x7ce   : > { %v1310_v19 = vmul.f32 %v1945_v18, %v1305_v4  ;;  %v1773_v20 = vpop.f32.mrb[17].mxu1 }
 0x7d0   : > { %1320 = vrot.lane.b32.xlu1 %v1310_v19, %s2015_s20  ;;  %s1554_s20 = sshll.u32 %s2075_s25, 7  ;;  %s2018_s25 = smov [#allocation2]  }
 0x7d1   : > { %s2426_s10 = scalar_lea.hbm %s2475_s6, %s1554_s20  ;;  %s1952_s13 = sshll.u32 %s2018_s25, 4  ;;  %s1953_s13 = int_to_ptr.vmem [resolvable:$false] %s1952_s13 }
 0x7d2   : > { %s1954_s14 = scalar_lea.vmem %s1953_s13, 256  ;;  %p1955_p0 = scmp.lt.s32.totalorder %s2428_s28, %s1953_s13 }
 0x7d3   : > { %p1956_p1 = scmp.lt.s32.totalorder %s1954_s14, %s1948_s12 }
 0x7d5   : > { %p1957_p2 = por %p1956_p1, %p1955_p0 }
 0x7d7   : > { %p1958_p3 = pnand %p1957_p2, %p1951_p13 }
 0x842   : > { %v1321_v27 = vpop.permute.xlu1 %1320 }
 0x843   : > { %v1327_v28 = vsel %vm1326_vm5, %v1325_v26, %v1321_v27 }
 0x844   : > { %1783 = vmatmul.mubr.f32.vlgmr.msra.gmra.mrb[18].mxu1 %v1327_v28 }
 0x917   : > { %v1405_v30 = vpop.f32.mrb[18].mxu1 }
 0x918   : > { %v1406_v31 = vadd.f32 %v1552_v29, %v1405_v30  ;;  %v1784_v32 = vpop.f32.mrb[19].mxu1 }
 0x91a   : > { %1409 = vst.msk [vmem:[%s242_s26] sm:$0xff] %vm264_vm0, %v1406_v31 }
 0x91b   : > { %1961 = shalt.err (!%p1958_p3)
}
 0x91c   : > { %s1962_s15 = scalar_lea.hbm %s2426_s10, 128  ;;  %s1966_s18 = scalar_lea.hbm %s2475_s6, 256 }
 0x91d   : > { %p1963_p4 = scmp.ne.s32.totalorder %s2426_s10, %s1962_s15  ;;  %p1967_p9 = scmp.lt.u32.totalorder %s2426_s10, %s2475_s6 }
 0x91e   : > { %p1968_p10 = scmp.lt.u32.totalorder %s1966_s18, %s1962_s15  ;;  %p1970_p12 = scmp.lt.u32.totalorder %s1962_s15, %s2426_s10 }
 0x91f   : > { %p1964_p7 = pnand %p1963_p4, %p2092_p5 }
 0x920   : > { %p1969_p11 = por %p1968_p10, %p1967_p9 }
 0x921   : > { %p1965_p8 = pneg %p1964_p7 }
 0x922   : > { %p1971_p13 = por %p1970_p12, %p1969_p11 }
 0x924   : > { %p1972_p0 = pnand %p1971_p13, %p1965_p8 }
 0x926   : > { %1975 = shalt.err (!%p1972_p0)
}
 0x927   : > { %1887 = dma.vmem_to_hbm [thread:$0]  (%p2092_p5), %s2428_s28, 128, %s2426_s10, %s1411_s11  }
 0x928 PF: > { %p1893_p1 = scmp.ge.s32.totalorder %s2010_s24, 2  ;;  %s1436_s26 = sand.u32 1, %s1998_s21  }
 0x929   : > { %s1437_s29 = scalar_lea.sflag [#allocation3], %s1436_s26 }
 0x92a   : > { %p1890_p2 = pnand %p1893_p1, %p2096_p6 }
 0x92c   : > { %1993 = dma.done.wait (!%p1890_p2), %s1437_s29, 128  }
 0x92d   : > { %1995 = vsyncadd (!%p1890_p2), %s1437_s29, 4294967168  ;;  %p16_p3 = scmp.ge.s32.totalorder %s2079_s27, 4   ;;  %s2480_s21 = smov %s2002_s22 }
 0x92e   : > { %s2481_s22 = smov %s2006_s23  ;;  %s2482_s23 = smov %s2090_s30 }
 0x92f   : > { %s2483_s24 = smov %s2079_s27  ;;  %18 = sbr.rel (!%p16_p3) target bundleno = 3 (0x3), region = 79 }
 0x936   :  { %1442 = vsyncpa [#allocation3], 1 }
 0x937   :  { %1444 = vsyncpa [#allocation3 + $0x1], 1 }

</bundles_post_ra>
